<compile_context>
chip_gen: v5e
topology: v5e:2x2
jax: 0.10.0
libtpu: 0.0.40
codegen_flags: <defaults>
</compile_context>

<pallas_src>
import functools

import jax
import jax.numpy as jnp
from jax.experimental import pallas as pl
from jax.experimental.pallas import tpu as pltpu

_NEG_BIG = -1e30  # finite "minus infinity" (avoids inf - inf -> NaN)


def _round_up(x: int, m: int) -> int:
    return ((x + m - 1) // m) * m


def _make_kernel(n_valid: int, c_valid: int, tile_n: int, tile_c: int,
                 c_tiles: int):
    """Builds the cross-entropy kernel; all sizes are static Python ints."""
    ragged_c = (c_valid % tile_c) != 0  # static: does a ragged C tile exist?

    def kernel(logits_ref, target_ref, out_ref, m_sc, s_sc, t_sc):
        i = pl.program_id(0)          # batch-tile index   ("parallel")
        j = pl.program_id(1)          # class-tile index   ("arbitrary" / reduce)

        @pl.when(j == 0)
        def _init():
            m_sc[...] = jnp.full_like(m_sc, _NEG_BIG)
            s_sc[...] = jnp.zeros_like(s_sc)
            t_sc[...] = jnp.zeros_like(t_sc)

        # Upcast in-register; HBM traffic stays in the input's native dtype.
        x = logits_ref[...].astype(jnp.float32)            # (tile_n, tile_c)

        # j-independent lane iota, reused for ragged-C mask and target gather.
        col = jax.lax.broadcasted_iota(jnp.int32, x.shape, 1)

        if ragged_c:
            # Only the last C tile has columns >= C; for interior tiles the
            # limit is >= tile_c so the select is a no-op.  Emitted only when
            # C is not tile-aligned (static), so aligned shapes pay nothing.
            x = jnp.where(col < (c_valid - j * tile_c), x, _NEG_BIG)

        # --- online logsumexp over the class axis --------------------------
        m_prev = m_sc[...]
        m_new = jnp.maximum(m_prev, jnp.max(x, axis=-1, keepdims=True))
        alpha = jnp.exp(m_prev - m_new)                     # rescale old sum
        s_sc[...] = alpha * s_sc[...] + jnp.sum(
            jnp.exp(x - m_new), axis=-1, keepdims=True)
        m_sc[...] = m_new

        # --- accumulate the target-class logit (select, no one-hot mul) ----
        # Offset goes on the (tile_n, 1) target, not the full-tile iota.
        tgt_local = target_ref[...] - j * tile_c            # (tile_n, 1) int32
        t_sc[...] += jnp.sum(
            jnp.where(col == tgt_local, x, 0.0), axis=-1, keepdims=True)

        # --- finalize: per-row loss; ragged N rows selected to exactly 0 ---
        @pl.when(j == c_tiles - 1)
        def _finalize():
            row = jax.lax.broadcasted_iota(jnp.int32, (tile_n, 1), 0) \
                + i * tile_n
            lse = m_sc[...] + jnp.log(s_sc[...])
            loss = lse - t_sc[...]
            # Select (not multiply): garbage rows may hold NaN/Inf.
            out_ref[...] = jnp.where(row < n_valid, loss, 0.0)

    return kernel


@functools.partial(jax.jit, static_argnames=("tile_n", "tile_c"))
def cross_entropy_loss(logits: jax.Array, target: jax.Array,
                       *, tile_n: int | None = None,
                       tile_c: int | None = None) -> jax.Array:
    """Mean softmax cross-entropy, matching F.cross_entropy(logits, target)."""
    n, c = logits.shape
    itemsize = jnp.dtype(logits.dtype).itemsize

    # C tile: 4 MiB logits block (8 MiB double-buffered -> safe on v5e/v6e/v7x
    # default scoped VMEM), never larger than the (128-rounded) class count.
    if tile_c is None:
        tile_c = 8192 if itemsize <= 2 else 4096
    tile_c = min(tile_c, _round_up(c, 128))

    # N tile: 256 by default, but shrink so n_tiles >= 2 whenever possible so
    # the "parallel" batch axis can shard across both v7x TensorCores.
    if tile_n is None:
        tile_n = 256
    tile_n = min(tile_n, max(8, _round_up(-(-n // 2), 8)))

    n_tiles = pl.cdiv(n, tile_n)
    c_tiles = pl.cdiv(c, tile_c)

    tgt2d = target.astype(jnp.int32).reshape(n, 1)
    kernel = _make_kernel(n, c, tile_n, tile_c, c_tiles)

    per_row = pl.pallas_call(
        kernel,
        out_shape=jax.ShapeDtypeStruct((n, 1), jnp.float32),
        grid_spec=pltpu.PrefetchScalarGridSpec(
            num_scalar_prefetch=0,
            grid=(n_tiles, c_tiles),
            in_specs=[
                pl.BlockSpec((tile_n, tile_c), lambda i, j: (i, j)),
                pl.BlockSpec((tile_n, 1), lambda i, j: (i, 0)),
            ],
            out_specs=pl.BlockSpec((tile_n, 1), lambda i, j: (i, 0)),
            scratch_shapes=[pltpu.VMEM((tile_n, 1), jnp.float32)] * 3,
        ),
        compiler_params=pltpu.CompilerParams(
            dimension_semantics=("parallel", "arbitrary"),
            vmem_limit_bytes=32 * 1024 * 1024,
        ),
        cost_estimate=pl.CostEstimate(
            flops=5 * n * c,
            transcendentals=n * c,
            bytes_accessed=n * c * itemsize + 4 * n + 4 * n,
        ),
    )(logits, tgt2d)

    # Tiny wrapper-side reduction (invalid rows are exact zeros).
    return jnp.sum(per_row) / jnp.float32(n)


class SimpleLoss:
    """JAX/Pallas port of the PyTorch SimpleLoss module."""

    def __init__(self):
        self.loss_a = None
        self.loss_p = None

    def __call__(self, logits, target):
        return cross_entropy_loss(logits, target)


def _reference(logits, target):
    n = logits.shape[0]
    lf = logits.astype(jnp.float32)
    return jnp.mean(jax.nn.logsumexp(lf, axis=-1) - lf[jnp.arange(n), target])


if __name__ == "__main__":
    key = jax.random.PRNGKey(0)
    loss_mod = SimpleLoss()

    # --- primary small test (matches the module's expected usage) ----------
    k_logits, k_target = jax.random.split(key)
    N, C = 8, 32  # batch=8, num_classes=32
    logits = jax.random.normal(k_logits, (N, C), dtype=jnp.float32)
    target = jax.random.randint(k_target, (N,), 0, C, dtype=jnp.int32)

    loss = loss_mod(logits, target)
    jax.block_until_ready(loss)
    ref = _reference(logits, target)
    assert jnp.allclose(loss, ref, atol=1e-5), (loss, ref)

    # --- secondary test: ragged N and C tiles (no wrapper padding) ---------
    k2a, k2b = jax.random.split(jax.random.PRNGKey(0), 2)
    N2, C2 = 260, 3000  # 2 ragged N tiles, 1 ragged C tile
    logits2 = jax.random.normal(k2a, (N2, C2), dtype=jnp.float32)
    target2 = jax.random.randint(k2b, (N2,), 0, C2, dtype=jnp.int32)

    loss2 = loss_mod(logits2, target2)
    jax.block_until_ready(loss2)
    ref2 = _reference(logits2, target2)
    assert jnp.allclose(loss2, ref2, atol=1e-4, rtol=1e-4), (loss2, ref2)

    print("KERNEL_OK")
</pallas_src>

<mosaic_0001>
module attributes {stable_mosaic.version = 11 : i64} {
  func.func @kernel(%arg0: i32, %arg1: i32, %arg2: memref<8x128xf32, #tpu.memory_space<vmem>>, %arg3: memref<8x1xi32, #tpu.memory_space<vmem>>, %arg4: memref<8x1xf32, #tpu.memory_space<vmem>>, %arg5: memref<8x1xf32, #tpu.memory_space<vmem>>, %arg6: memref<8x1xf32, #tpu.memory_space<vmem>>, %arg7: memref<8x1xf32, #tpu.memory_space<vmem>>) attributes {dimension_semantics = [#tpu.dimension_semantics<parallel>, #tpu.dimension_semantics<arbitrary>], iteration_bounds = array<i64: 1, 1>, scalar_prefetch = 0 : i64, scratch_operands = 3 : i64, tpu.core_type = #tpu.core_type<tc>, window_params = [{transform_indices = @transform_0, window_bounds = array<i64: 8, 128>}, {transform_indices = @transform_1, window_bounds = array<i64: 8, 1>}, {transform_indices = @transform_2, window_bounds = array<i64: 8, 1>}]} {
    %c0_i32 = arith.constant 0 : i32
    %0 = arith.cmpi eq, %arg1, %c0_i32 : i32
    %1 = arith.extui %0 : i1 to i32
    %c0_i32_0 = arith.constant 0 : i32
    %2 = arith.cmpi ne, %1, %c0_i32_0 : i32
    scf.if %2 {
      %cst_23 = arith.constant -1.000000e+30 : f32
      %43 = vector.broadcast %cst_23 : f32 to vector<8x1xf32>
      %c0_24 = arith.constant 0 : index
      %c0_25 = arith.constant 0 : index
      %44 = vector.load %arg5[%c0_24, %c0_25] : memref<8x1xf32, #tpu.memory_space<vmem>>, vector<8x1xf32>
      tpu.vector_store %arg5[%c0_24, %c0_25], %43 {strides = array<i32>} : memref<8x1xf32, #tpu.memory_space<vmem>>, vector<8x1xf32>,
      %cst_26 = arith.constant 0.000000e+00 : f32
      %45 = vector.broadcast %cst_26 : f32 to vector<8x1xf32>
      %c0_27 = arith.constant 0 : index
      %c0_28 = arith.constant 0 : index
      %46 = vector.load %arg6[%c0_27, %c0_28] : memref<8x1xf32, #tpu.memory_space<vmem>>, vector<8x1xf32>
      tpu.vector_store %arg6[%c0_27, %c0_28], %45 {strides = array<i32>} : memref<8x1xf32, #tpu.memory_space<vmem>>, vector<8x1xf32>,
      %cst_29 = arith.constant 0.000000e+00 : f32
      %47 = vector.broadcast %cst_29 : f32 to vector<8x1xf32>
      %c0_30 = arith.constant 0 : index
      %c0_31 = arith.constant 0 : index
      %48 = vector.load %arg7[%c0_30, %c0_31] : memref<8x1xf32, #tpu.memory_space<vmem>>, vector<8x1xf32>
      tpu.vector_store %arg7[%c0_30, %c0_31], %47 {strides = array<i32>} : memref<8x1xf32, #tpu.memory_space<vmem>>, vector<8x1xf32>,
    } else {
    }
    %c0 = arith.constant 0 : index
    %c0_1 = arith.constant 0 : index
    %3 = vector.load %arg2[%c0, %c0_1] : memref<8x128xf32, #tpu.memory_space<vmem>>, vector<8x128xf32>
    %4 = tpu.iota {dimensions = array<i32: 1>} : vector<8x128xi32>
    %c128_i32 = arith.constant 128 : i32
    %5 = arith.muli %arg1, %c128_i32 : i32
    %c32_i32 = arith.constant 32 : i32
    %6 = arith.subi %c32_i32, %5 : i32
    %7 = vector.broadcast %6 : i32 to vector<8x128xi32>
    %8 = arith.cmpi slt, %4, %7 : vector<8x128xi32>
    %cst = arith.constant -1.000000e+30 : f32
    %9 = vector.broadcast %cst : f32 to vector<8x128xf32>
    %10 = arith.select %8, %3, %9 : vector<8x128xi1>, vector<8x128xf32>
    %c0_2 = arith.constant 0 : index
    %c0_3 = arith.constant 0 : index
    %11 = vector.load %arg5[%c0_2, %c0_3] : memref<8x1xf32, #tpu.memory_space<vmem>>, vector<8x1xf32>
    %cst_4 = arith.constant dense<0xFF800000> : vector<8xf32>
    %12 = vector.multi_reduction <maximumf>, %10, %cst_4 [1] : vector<8x128xf32> to vector<8xf32>
    %13 = vector.shape_cast %12 : vector<8xf32> to vector<8x1xf32>
    %14 = arith.maximumf %11, %13 : vector<8x1xf32>
    %15 = arith.subf %11, %14 : vector<8x1xf32>
    %16 = math.exp %15 : vector<8x1xf32>
    %c0_5 = arith.constant 0 : index
    %c0_6 = arith.constant 0 : index
    %17 = vector.load %arg6[%c0_5, %c0_6] : memref<8x1xf32, #tpu.memory_space<vmem>>, vector<8x1xf32>
    %18 = arith.mulf %16, %17 : vector<8x1xf32>
    %19 = vector.broadcast %14 : vector<8x1xf32> to vector<8x128xf32>
    %20 = arith.subf %10, %19 : vector<8x128xf32>
    %21 = math.exp %20 : vector<8x128xf32>
    %cst_7 = arith.constant dense<0.000000e+00> : vector<8xf32>
    %22 = vector.multi_reduction <add>, %21, %cst_7 [1] : vector<8x128xf32> to vector<8xf32>
    %23 = vector.shape_cast %22 : vector<8xf32> to vector<8x1xf32>
    %24 = arith.addf %18, %23 : vector<8x1xf32>
    %c0_8 = arith.constant 0 : index
    %c0_9 = arith.constant 0 : index
    %25 = vector.load %arg6[%c0_8, %c0_9] : memref<8x1xf32, #tpu.memory_space<vmem>>, vector<8x1xf32>
    tpu.vector_store %arg6[%c0_8, %c0_9], %24 {strides = array<i32>} : memref<8x1xf32, #tpu.memory_space<vmem>>, vector<8x1xf32>,
    %c0_10 = arith.constant 0 : index
    %c0_11 = arith.constant 0 : index
    %26 = vector.load %arg5[%c0_10, %c0_11] : memref<8x1xf32, #tpu.memory_space<vmem>>, vector<8x1xf32>
    tpu.vector_store %arg5[%c0_10, %c0_11], %14 {strides = array<i32>} : memref<8x1xf32, #tpu.memory_space<vmem>>, vector<8x1xf32>,
    %c0_12 = arith.constant 0 : index
    %c0_13 = arith.constant 0 : index
    %27 = vector.load %arg3[%c0_12, %c0_13] : memref<8x1xi32, #tpu.memory_space<vmem>>, vector<8x1xi32>
    %c128_i32_14 = arith.constant 128 : i32
    %28 = arith.muli %arg1, %c128_i32_14 : i32
    %29 = vector.broadcast %28 : i32 to vector<8x1xi32>
    %30 = arith.subi %27, %29 : vector<8x1xi32>
    %c0_15 = arith.constant 0 : index
    %c0_16 = arith.constant 0 : index
    %31 = vector.load %arg7[%c0_15, %c0_16] : memref<8x1xf32, #tpu.memory_space<vmem>>, vector<8x1xf32>
    %32 = vector.broadcast %30 : vector<8x1xi32> to vector<8x128xi32>
    %33 = arith.cmpi eq, %4, %32 : vector<8x128xi32>
    %cst_17 = arith.constant 0.000000e+00 : f32
    %34 = vector.broadcast %cst_17 : f32 to vector<8x128xf32>
    %35 = arith.select %33, %10, %34 : vector<8x128xi1>, vector<8x128xf32>
    %cst_18 = arith.constant dense<0.000000e+00> : vector<8xf32>
    %36 = vector.multi_reduction <add>, %35, %cst_18 [1] : vector<8x128xf32> to vector<8xf32>
    %37 = vector.shape_cast %36 : vector<8xf32> to vector<8x1xf32>
    %38 = arith.addf %31, %37 : vector<8x1xf32>
    %c0_19 = arith.constant 0 : index
    %c0_20 = arith.constant 0 : index
    %39 = vector.load %arg7[%c0_19, %c0_20] : memref<8x1xf32, #tpu.memory_space<vmem>>, vector<8x1xf32>
    tpu.vector_store %arg7[%c0_19, %c0_20], %38 {strides = array<i32>} : memref<8x1xf32, #tpu.memory_space<vmem>>, vector<8x1xf32>,
    %c0_i32_21 = arith.constant 0 : i32
    %40 = arith.cmpi eq, %arg1, %c0_i32_21 : i32
    %41 = arith.extui %40 : i1 to i32
    %c0_i32_22 = arith.constant 0 : i32
    %42 = arith.cmpi ne, %41, %c0_i32_22 : i32
    scf.if %42 {
      %43 = tpu.iota {dimensions = array<i32: 0>} : vector<8x1xi32>
      %c8_i32 = arith.constant 8 : i32
      %44 = arith.muli %arg0, %c8_i32 : i32
      %45 = vector.broadcast %44 : i32 to vector<8x1xi32>
      %46 = arith.addi %43, %45 : vector<8x1xi32>
      %c0_23 = arith.constant 0 : index
      %c0_24 = arith.constant 0 : index
      %47 = vector.load %arg5[%c0_23, %c0_24] : memref<8x1xf32, #tpu.memory_space<vmem>>, vector<8x1xf32>
      %c0_25 = arith.constant 0 : index
      %c0_26 = arith.constant 0 : index
      %48 = vector.load %arg6[%c0_25, %c0_26] : memref<8x1xf32, #tpu.memory_space<vmem>>, vector<8x1xf32>
      %49 = math.log %48 : vector<8x1xf32>
      %50 = arith.addf %47, %49 : vector<8x1xf32>
      %c0_27 = arith.constant 0 : index
      %c0_28 = arith.constant 0 : index
      %51 = vector.load %arg7[%c0_27, %c0_28] : memref<8x1xf32, #tpu.memory_space<vmem>>, vector<8x1xf32>
      %52 = arith.subf %50, %51 : vector<8x1xf32>
      %c8_i32_29 = arith.constant 8 : i32
      %53 = vector.broadcast %c8_i32_29 : i32 to vector<8x1xi32>
      %54 = arith.cmpi slt, %46, %53 : vector<8x1xi32>
      %cst_30 = arith.constant 0.000000e+00 : f32
      %55 = vector.broadcast %cst_30 : f32 to vector<8x1xf32>
      %56 = arith.select %54, %52, %55 : vector<8x1xi1>, vector<8x1xf32>
      %c0_31 = arith.constant 0 : index
      %c0_32 = arith.constant 0 : index
      %57 = vector.load %arg4[%c0_31, %c0_32] : memref<8x1xf32, #tpu.memory_space<vmem>>, vector<8x1xf32>
      tpu.vector_store %arg4[%c0_31, %c0_32], %56 {strides = array<i32>} : memref<8x1xf32, #tpu.memory_space<vmem>>, vector<8x1xf32>,
    } else {
    }
    return
  }
  func.func @transform_0(%arg0: i32, %arg1: i32) -> (i32, i32) {
    %c0_i32 = arith.constant 0 : i32
    return %arg0, %arg1 : i32, i32
  }
  func.func @transform_1(%arg0: i32, %arg1: i32) -> (i32, i32) {
    %c0_i32 = arith.constant 0 : i32
    %c0_i32_0 = arith.constant 0 : i32
    return %arg0, %c0_i32 : i32, i32
  }
  func.func @transform_2(%arg0: i32, %arg1: i32) -> (i32, i32) {
    %c0_i32 = arith.constant 0 : i32
    %c0_i32_0 = arith.constant 0 : i32
    return %arg0, %c0_i32 : i32, i32
  }
}

</mosaic_0001>

<bundles_post_ra>
// kernel: cross_entropy_loss.1
= control target key start
LH: loop header
LB: loop body
LE: loop exit
PB: predicated region body
PF: predicated region fallthrough
CT: control target
= control target key end

     0   :  { %v20_v0 = vlaneseq  ;;  %vm15_vm0 = vcmask 7168   ;;  %v96_v1 = vmov -1e+30   ;;  %v97_v5 = vmov 0   ;;  %s130_s0 = inlined_call_operand.vmem [shape: f32[8,32], index: 0, kind: input, shape index: {}]   ;;  %s131_s1 = inlined_call_operand.vmem [shape: s32[8,1], index: 1, kind: input, shape index: {}]   ;;  %s132_s2 = inlined_call_operand.vmem [shape: f32[8,1], index: 2, kind: output, shape index: {}]  }
   0x1   :  { %16 = vst.msk [vmem:[#allocation2] sm:$0xff] %vm15_vm0, %v96_v1  ;;  %v19_v2 = vld [vmem:[%s130_s0] sm:$0xff]  ;;  %88 = vset.pattern.permute.xlu0 %v97_v5  ;;  %89 = vset.pattern.permute.xlu1 %v97_v5  ;;  %v98_v6 = vmov 0.0  }
   0x2   :  { %v21_v3 = vand.u32 127, %v20_v0  ;;  %17 = vst.msk [vmem:[#allocation3] sm:$0xff] %vm15_vm0, %v98_v6  ;;  %v50_v7 = vld [vmem:[%s131_s1] sm:$0xff] }
   0x3   :  { %18 = vst.msk [vmem:[#allocation4] sm:$0xff] %vm15_vm0, %v98_v6  ;;  %55 = vperm.xlu1 %89, %v50_v7  }
   0x4   :  { %vm25_vm1 = vcmp.lt.s32.totalorder %v21_v3, 32 }
   0x5   :  { %v26_v4 = vsel %vm25_vm1, %v19_v2, -1e+30 }
   0x6   :  { %28 = vmax.xlane.f32.xlu0 %v26_v4 }
   0x8   :  { %v27_v8 = vld [vmem:[#allocation2] sm:$0xff] }
   0x9   :  { %v34_v23 = vld [vmem:[#allocation3] sm:$0xff] }
   0xa   :  { %v53_v18 = vld [vmem:[#allocation4] sm:$0xff] }
  0x75   :  { %v56_v12 = vpop.permute.xlu1 %55 }
  0x76   :  { %vm57_vm2 = vcmp.eq.s32.totalorder %v21_v3, %v56_v12 }
  0x77   :  { %v58_v13 = vsel %vm57_vm2, %v26_v4, 0.0 }
  0x78   :  { %59 = vadd.xlane.f32.xlu2 %v58_v13 }
  0x79   :  { %v29_v9 = vpop.xlane.xlu0 %28 }
  0x7a   :  { %v30_v10 = vmax.f32 %v27_v8, %v29_v9 }
  0x7c   :  { %v31_v11 = vsub.f32 %v27_v8, %v30_v10  ;;  %49 = vst.msk [vmem:[#allocation2] sm:$0xff] %vm15_vm0, %v30_v10  ;;  %38 = vperm.xlu0 %88, %v30_v10  }
  0x7e   :  { %v32_v21 = vmul.f32 1.442695, %v31_v11 }
  0x83   :  { %v71_v30 = vld [vmem:[#allocation2] sm:$0xff] }
  0xeb   :  { %v60_v19 = vpop.xlane.xlu2 %59 }
  0xec   :  { %v61_v20 = vadd.f32 %v60_v19, %v53_v18 }
  0xee   :  { %v39_v14 = vpop.permute.xlu0 %38  ;;  %62 = vst.msk [vmem:[#allocation4] sm:$0xff] %vm15_vm0, %v61_v20 }
  0xef   :  { %v41_v15 = vsub.f32 %v26_v4, %v39_v14 }
  0xf1   :  { %v42_v16 = vmul.f32 1.442695, %v41_v15 }
  0xf3   :  { %90 = vpow2.f32 %v42_v16 }
  0xf4   :  { %92 = vpow2.f32 %v32_v21 }
  0xf5   :  { %v76_v31 = vld [vmem:[#allocation4] sm:$0xff] }
  0xf9   :  { %v91_v17 = vpop.eup %90 }
  0xfa   :  { %44 = vadd.xlane.f32.xlu1 %v91_v17  ;;  %v93_v22 = vpop.eup %92 }
  0xfb   :  { %v35_v24 = vmul.f32 %v93_v22, %v34_v23 }
 0x16d   :  { %v45_v25 = vpop.xlane.xlu1 %44 }
 0x16e   :  { %v46_v26 = vadd.f32 %v45_v25, %v35_v24 }
 0x170   :  { %48 = vst.msk [vmem:[#allocation3] sm:$0xff] %vm15_vm0, %v46_v26 }
 0x177   :  { %v72_v27 = vld [vmem:[#allocation3] sm:$0xff] }
 0x178   :  { %94 = vlog2.f32 %v72_v27 }
 0x17e   :  { %v95_v28 = vpop.eup %94 }
 0x17f   :  { %v74_v29 = vmul.f32 0.6931472, %v95_v28 }
 0x181   :  { %v75_v32 = vadd.f32 %v74_v29, %v71_v30 }
 0x183   :  { %v77_v33 = vsub.f32 %v75_v32, %v76_v31 }
 0x185   :  { %80 = vst.msk [vmem:[%s132_s2] sm:$0xff] %vm15_vm0, %v77_v33 }

</bundles_post_ra>
